<compile_context>
chip_gen: v7x
topology: tpu7x:2x2x1
jax: 0.10.0
libtpu: 0.0.40
codegen_flags: <defaults>
</compile_context>

<pallas_src>
import functools

import jax
import jax.numpy as jnp
import numpy as np
from jax import lax
from jax.experimental import pallas as pl
from jax.experimental.pallas import tpu as pltpu


def _relu6(x):
    return jnp.clip(x, 0.0, 6.0)


def irb_kernel(x_ref, w1_ref, wdw_ref, w3_ref, b12_ref, b3_ref, o_ref,
               *, H, W, idt):
    # Block layouts (channel-major, spatial flattened onto the lane axis):
    #   x_ref   : (1, Cin,  H*W)  one image, NCHW flattened
    #   w1_ref  : (Cmid, Cin)     expand 1x1 weights, BN1 scale folded in
    #   wdw_ref : (Cmid, 9)       depthwise 3x3 taps,  BN2 scale folded in
    #   w3_ref  : (Cout, Cmid)    project 1x1 weights, BN3 scale folded in
    #   b12_ref : (Cmid, 2)       folded BN1 / BN2 biases
    #   b3_ref  : (Cout, 1)       folded BN3 bias
    #   o_ref   : (1, Cout, H*W)
    x = x_ref[0]                                    # (Cin, HW) f32
    HW = H * W
    Cmid = w1_ref.shape[0]

    # ---- 1x1 expand conv (MXU, spatial axis = wide N dim) + bias + ReLU6 ----
    h1 = jnp.dot(w1_ref[...], x, preferred_element_type=jnp.float32)
    h1 = _relu6(h1 + b12_ref[:, 0:1])               # (Cmid, HW)

    # ---- 3x3 depthwise conv, padding=1 (XLU rolls + boundary masks) ---------
    flat = lax.broadcasted_iota(jnp.int32, (Cmid, HW), 1)
    if (W & (W - 1)) == 0:                          # power-of-two width
        col = jnp.bitwise_and(flat, W - 1)
    else:
        col = flat % W
    top_ok = flat >= W                              # source row h-1 exists
    bot_ok = flat < (H - 1) * W                     # source row h+1 exists
    left_ok = col >= 1                              # source col w-1 exists
    right_ok = col <= W - 2                         # source col w+1 exists

    wdw = wdw_ref[...]                              # (Cmid, 9)
    acc = wdw[:, 4:5] * h1                          # center tap, no mask
    for oi in (-1, 0, 1):
        for oj in (-1, 0, 1):
            if oi == 0 and oj == 0:
                continue
            tap = (oi + 1) * 3 + (oj + 1)
            # shifted[f] = h1[f + oi*W + oj] (wrap positions are masked to 0)
            shift = (-(oi * W + oj)) % HW
            shifted = pltpu.roll(h1, shift=shift, axis=1)
            mask = None
            if oi == -1:
                mask = top_ok
            elif oi == 1:
                mask = bot_ok
            if oj == -1:
                mask = left_ok if mask is None else mask & left_ok
            elif oj == 1:
                mask = right_ok if mask is None else mask & right_ok
            shifted = jnp.where(mask, shifted, 0.0)
            acc = acc + wdw[:, tap:tap + 1] * shifted
    h2 = _relu6(acc + b12_ref[:, 1:2])              # (Cmid, HW)

    # ---- 1x1 project conv (MXU) + bias (final act = Identity) ---------------
    h3 = jnp.dot(w3_ref[...], h2, preferred_element_type=jnp.float32)
    h3 = h3 + b3_ref[...]                           # (Cout, HW)

    if idt:                                         # residual (stride=1, Cin==Cout)
        h3 = h3 + x
    o_ref[0] = h3


def fold_params(params):
    """Fold BN scales into conv weights; return channel-major kernel params."""
    w1, s1, b1, wdw, s2, b2, w3, s3, b3 = params
    Cmid = w1.shape[1]
    w1k = (w1 * s1).T.astype(jnp.float32)                         # (Cmid, Cin)
    wdwk = (wdw * s2.reshape(1, 1, Cmid)).reshape(9, Cmid).T      # (Cmid, 9)
    wdwk = wdwk.astype(jnp.float32)
    w3k = (w3 * s3).T.astype(jnp.float32)                         # (Cout, Cmid)
    b12 = jnp.stack([b1[0], b2[0]], axis=1).astype(jnp.float32)   # (Cmid, 2)
    b3k = b3.reshape(-1, 1).astype(jnp.float32)                   # (Cout, 1)
    return w1k, wdwk, w3k, b12, b3k


def irb_block(x_nchw, params, *, idt):
    """IRB block forward. NCHW in, NCHW out (stride=1; idt implies Cin==Cout)."""
    N, Cin, H, W = x_nchw.shape
    HW = H * W
    x = x_nchw.reshape(N, Cin, HW).astype(jnp.float32)   # free reshape (row-major)
    w1k, wdwk, w3k, b12, b3k = fold_params(params)
    Cout = w3k.shape[0]

    def const_spec(arr):                                  # grid-invariant operand
        nd = arr.ndim
        return pl.BlockSpec(arr.shape, lambda n, _nd=nd: (0,) * _nd)

    out = pl.pallas_call(
        functools.partial(irb_kernel, H=H, W=W, idt=idt),
        out_shape=jax.ShapeDtypeStruct((N, Cout, HW), jnp.float32),
        grid=(N,),
        in_specs=[
            pl.BlockSpec((1, Cin, HW), lambda n: (n, 0, 0)),
            const_spec(w1k), const_spec(wdwk), const_spec(w3k),
            const_spec(b12), const_spec(b3k),
        ],
        out_specs=pl.BlockSpec((1, Cout, HW), lambda n: (n, 0, 0)),
        compiler_params=pltpu.CompilerParams(
            dimension_semantics=("parallel",)),
    )(x, w1k, wdwk, w3k, b12, b3k)
    return out.reshape(N, Cout, H, W)                     # already NCHW: free reshape


def make_params(key, in_feats, out_feats=None, expand_ratio=6):
    """Deterministic synthetic params; BN folded to per-channel scale/bias."""
    out_feats = in_feats if out_feats is None else out_feats
    mid = round(in_feats * expand_ratio)
    eps = 1e-5
    ks = jax.random.split(key, 15)

    def bn_fold(kg, kb, km, kv, c):
        gamma = jax.random.uniform(kg, (c,), minval=0.5, maxval=1.5)
        beta = jax.random.normal(kb, (c,)) * 0.1
        mean = jax.random.normal(km, (c,)) * 0.1
        var = jax.random.uniform(kv, (c,), minval=0.5, maxval=1.5)
        s = gamma / jnp.sqrt(var + eps)
        b = beta - mean * s
        return (s.reshape(1, c).astype(jnp.float32),
                b.reshape(1, c).astype(jnp.float32))

    # conv weights: 1x1 convs stored as (Cin, Cout) matmul weights,
    # depthwise 3x3 stored as (3, 3, Cmid).
    w1 = (jax.random.normal(ks[0], (in_feats, mid)) * 0.2).astype(jnp.float32)
    s1, b1 = bn_fold(ks[1], ks[2], ks[3], ks[4], mid)
    wdw = (jax.random.normal(ks[5], (3, 3, mid)) * 0.2).astype(jnp.float32)
    s2, b2 = bn_fold(ks[6], ks[7], ks[8], ks[9], mid)
    w3 = (jax.random.normal(ks[10], (mid, out_feats)) * 0.2).astype(jnp.float32)
    s3, b3 = bn_fold(ks[11], ks[12], ks[13], ks[14], out_feats)
    return (w1, s1, b1, wdw, s2, b2, w3, s3, b3), (in_feats == out_feats)


def irb_reference(x_nchw, params, *, idt):
    """Pure-JAX reference using lax.conv_general_dilated (NHWC)."""
    x = jnp.transpose(x_nchw, (0, 2, 3, 1)).astype(jnp.float32)
    w1, s1, b1, wdw, s2, b2, w3, s3, b3 = params
    Cin, Cmid = w1.shape
    Cout = w3.shape[1]

    dn1 = lax.conv_dimension_numbers(x.shape, (1, 1, Cin, Cmid),
                                     ("NHWC", "HWIO", "NHWC"))
    h = lax.conv_general_dilated(x, w1.reshape(1, 1, Cin, Cmid), (1, 1),
                                 "SAME", dimension_numbers=dn1)
    h = jnp.clip(h * s1 + b1, 0.0, 6.0)

    dn2 = lax.conv_dimension_numbers(h.shape, (3, 3, 1, Cmid),
                                     ("NHWC", "HWIO", "NHWC"))
    h = lax.conv_general_dilated(h, wdw.reshape(3, 3, 1, Cmid), (1, 1),
                                 "SAME", dimension_numbers=dn2,
                                 feature_group_count=Cmid)
    h = jnp.clip(h * s2 + b2, 0.0, 6.0)

    dn3 = lax.conv_dimension_numbers(h.shape, (1, 1, Cmid, Cout),
                                     ("NHWC", "HWIO", "NHWC"))
    h = lax.conv_general_dilated(h, w3.reshape(1, 1, Cmid, Cout), (1, 1),
                                 "SAME", dimension_numbers=dn3)
    h = h * s3 + b3                      # final act = Identity (act='idt')
    y = x + h if idt else h
    return jnp.transpose(y, (0, 3, 1, 2))


if __name__ == "__main__":
    key = jax.random.PRNGKey(0)
    k_x, k_p = jax.random.split(key)

    # IRB_Block(in_feats=4) -> mid=24, out=4, identity residual, act='idt'
    N, C, H, W = 2, 4, 16, 16
    x = jax.random.normal(k_x, (N, C, H, W), dtype=jnp.float32)   # NCHW
    params, idt = make_params(k_p, in_feats=C, expand_ratio=6)

    out = irb_block(x, params, idt=idt)
    out = jax.block_until_ready(out)

    ref = jax.block_until_ready(irb_reference(x, params, idt=idt))
    np.testing.assert_allclose(np.asarray(out), np.asarray(ref),
                               rtol=1e-5, atol=2e-4)
    assert out.shape == (N, C, H, W)
    print("KERNEL_OK")
</pallas_src>

<mosaic_0001>
module attributes {stable_mosaic.version = 11 : i64} {
  func.func @irb_kernel(%arg0: i32, %arg1: memref<1x4x256xf32, #tpu.memory_space<vmem>>, %arg2: memref<24x4xf32, #tpu.memory_space<vmem>>, %arg3: memref<24x9xf32, #tpu.memory_space<vmem>>, %arg4: memref<4x24xf32, #tpu.memory_space<vmem>>, %arg5: memref<24x2xf32, #tpu.memory_space<vmem>>, %arg6: memref<4x1xf32, #tpu.memory_space<vmem>>, %arg7: memref<1x4x256xf32, #tpu.memory_space<vmem>>) attributes {dimension_semantics = [#tpu.dimension_semantics<parallel>], iteration_bounds = array<i64: 2>, scalar_prefetch = 0 : i64, scratch_operands = 0 : i64, tpu.core_type = #tpu.core_type<tc>, window_params = [{transform_indices = @transform_0, window_bounds = array<i64: 1, 4, 256>}, {pipeline_mode = #tpu.pipeline_mode<synchronous>, transform_indices = @transform_1, window_bounds = array<i64: 24, 4>}, {pipeline_mode = #tpu.pipeline_mode<synchronous>, transform_indices = @transform_2, window_bounds = array<i64: 24, 9>}, {pipeline_mode = #tpu.pipeline_mode<synchronous>, transform_indices = @transform_3, window_bounds = array<i64: 4, 24>}, {pipeline_mode = #tpu.pipeline_mode<synchronous>, transform_indices = @transform_4, window_bounds = array<i64: 24, 2>}, {pipeline_mode = #tpu.pipeline_mode<synchronous>, transform_indices = @transform_5, window_bounds = array<i64: 4, 1>}, {transform_indices = @transform_6, window_bounds = array<i64: 1, 4, 256>}]} {
    %c0 = arith.constant 0 : index
    %c0_0 = arith.constant 0 : index
    %c0_1 = arith.constant 0 : index
    %0 = vector.load %arg1[%c0, %c0_0, %c0_1] : memref<1x4x256xf32, #tpu.memory_space<vmem>>, vector<1x4x256xf32>
    %1 = vector.shape_cast %0 : vector<1x4x256xf32> to vector<4x256xf32>
    %c0_2 = arith.constant 0 : index
    %c0_3 = arith.constant 0 : index
    %2 = vector.load %arg2[%c0_2, %c0_3] : memref<24x4xf32, #tpu.memory_space<vmem>>, vector<24x4xf32>
    %cst = arith.constant dense<0.000000e+00> : vector<24x256xf32>
    %3 = tpu.matmul %2, %1, %cst {dimension_numbers = #tpu.dot_dimension_numbers<[1], [0], [0], [1], [0, 0, 1, 1], [], []>} : vector<24x4xf32>, vector<4x256xf32>, vector<24x256xf32> -> vector<24x256xf32>
    %c0_4 = arith.constant 0 : index
    %c0_5 = arith.constant 0 : index
    %4 = vector.load %arg5[%c0_4, %c0_5] : memref<24x2xf32, #tpu.memory_space<vmem>>, vector<24x1xf32>
    %5 = vector.broadcast %4 : vector<24x1xf32> to vector<24x256xf32>
    %6 = arith.addf %3, %5 : vector<24x256xf32>
    %cst_6 = arith.constant 0.000000e+00 : f32
    %cst_7 = arith.constant 6.000000e+00 : f32
    %7 = vector.broadcast %cst_6 : f32 to vector<24x256xf32>
    %8 = arith.maximumf %7, %6 : vector<24x256xf32>
    %9 = vector.broadcast %cst_7 : f32 to vector<24x256xf32>
    %10 = arith.minimumf %9, %8 : vector<24x256xf32>
    %11 = tpu.iota {dimensions = array<i32: 1>} : vector<24x256xi32>
    %c15_i32 = arith.constant 15 : i32
    %12 = vector.broadcast %c15_i32 : i32 to vector<24x256xi32>
    %13 = arith.andi %11, %12 : vector<24x256xi32>
    %c16_i32 = arith.constant 16 : i32
    %14 = vector.broadcast %c16_i32 : i32 to vector<24x256xi32>
    %15 = arith.cmpi sge, %11, %14 : vector<24x256xi32>
    %c240_i32 = arith.constant 240 : i32
    %16 = vector.broadcast %c240_i32 : i32 to vector<24x256xi32>
    %17 = arith.cmpi slt, %11, %16 : vector<24x256xi32>
    %c1_i32 = arith.constant 1 : i32
    %18 = vector.broadcast %c1_i32 : i32 to vector<24x256xi32>
    %19 = arith.cmpi sge, %13, %18 : vector<24x256xi32>
    %c14_i32 = arith.constant 14 : i32
    %20 = vector.broadcast %c14_i32 : i32 to vector<24x256xi32>
    %21 = arith.cmpi sle, %13, %20 : vector<24x256xi32>
    %c0_8 = arith.constant 0 : index
    %c0_9 = arith.constant 0 : index
    %22 = vector.load %arg3[%c0_8, %c0_9] : memref<24x9xf32, #tpu.memory_space<vmem>>, vector<24x9xf32>
    %23 = vector.extract_strided_slice %22 {offsets = [0, 4], sizes = [24, 1], strides = [1, 1]} : vector<24x9xf32> to vector<24x1xf32>
    %24 = vector.broadcast %23 : vector<24x1xf32> to vector<24x256xf32>
    %25 = arith.mulf %24, %10 : vector<24x256xf32>
    %c17_i32 = arith.constant 17 : i32
    %26 = tpu.dynamic_rotate %10 by %c17_i32 dim 1 : vector<24x256xf32>, i32 -> vector<24x256xf32>
    %27 = arith.andi %15, %19 : vector<24x256xi1>
    %cst_10 = arith.constant 0.000000e+00 : f32
    %28 = vector.broadcast %cst_10 : f32 to vector<24x256xf32>
    %29 = arith.select %27, %26, %28 : vector<24x256xi1>, vector<24x256xf32>
    %30 = vector.extract_strided_slice %22 {offsets = [0, 0], sizes = [24, 1], strides = [1, 1]} : vector<24x9xf32> to vector<24x1xf32>
    %31 = vector.broadcast %30 : vector<24x1xf32> to vector<24x256xf32>
    %32 = arith.mulf %31, %29 : vector<24x256xf32>
    %33 = arith.addf %25, %32 : vector<24x256xf32>
    %c16_i32_11 = arith.constant 16 : i32
    %34 = tpu.dynamic_rotate %10 by %c16_i32_11 dim 1 : vector<24x256xf32>, i32 -> vector<24x256xf32>
    %cst_12 = arith.constant 0.000000e+00 : f32
    %35 = vector.broadcast %cst_12 : f32 to vector<24x256xf32>
    %36 = arith.select %15, %34, %35 : vector<24x256xi1>, vector<24x256xf32>
    %37 = vector.extract_strided_slice %22 {offsets = [0, 1], sizes = [24, 1], strides = [1, 1]} : vector<24x9xf32> to vector<24x1xf32>
    %38 = vector.broadcast %37 : vector<24x1xf32> to vector<24x256xf32>
    %39 = arith.mulf %38, %36 : vector<24x256xf32>
    %40 = arith.addf %33, %39 : vector<24x256xf32>
    %c15_i32_13 = arith.constant 15 : i32
    %41 = tpu.dynamic_rotate %10 by %c15_i32_13 dim 1 : vector<24x256xf32>, i32 -> vector<24x256xf32>
    %42 = arith.andi %15, %21 : vector<24x256xi1>
    %cst_14 = arith.constant 0.000000e+00 : f32
    %43 = vector.broadcast %cst_14 : f32 to vector<24x256xf32>
    %44 = arith.select %42, %41, %43 : vector<24x256xi1>, vector<24x256xf32>
    %45 = vector.extract_strided_slice %22 {offsets = [0, 2], sizes = [24, 1], strides = [1, 1]} : vector<24x9xf32> to vector<24x1xf32>
    %46 = vector.broadcast %45 : vector<24x1xf32> to vector<24x256xf32>
    %47 = arith.mulf %46, %44 : vector<24x256xf32>
    %48 = arith.addf %40, %47 : vector<24x256xf32>
    %c1_i32_15 = arith.constant 1 : i32
    %49 = tpu.dynamic_rotate %10 by %c1_i32_15 dim 1 : vector<24x256xf32>, i32 -> vector<24x256xf32>
    %cst_16 = arith.constant 0.000000e+00 : f32
    %50 = vector.broadcast %cst_16 : f32 to vector<24x256xf32>
    %51 = arith.select %19, %49, %50 : vector<24x256xi1>, vector<24x256xf32>
    %52 = vector.extract_strided_slice %22 {offsets = [0, 3], sizes = [24, 1], strides = [1, 1]} : vector<24x9xf32> to vector<24x1xf32>
    %53 = vector.broadcast %52 : vector<24x1xf32> to vector<24x256xf32>
    %54 = arith.mulf %53, %51 : vector<24x256xf32>
    %55 = arith.addf %48, %54 : vector<24x256xf32>
    %c255_i32 = arith.constant 255 : i32
    %56 = tpu.dynamic_rotate %10 by %c255_i32 dim 1 : vector<24x256xf32>, i32 -> vector<24x256xf32>
    %cst_17 = arith.constant 0.000000e+00 : f32
    %57 = vector.broadcast %cst_17 : f32 to vector<24x256xf32>
    %58 = arith.select %21, %56, %57 : vector<24x256xi1>, vector<24x256xf32>
    %59 = vector.extract_strided_slice %22 {offsets = [0, 5], sizes = [24, 1], strides = [1, 1]} : vector<24x9xf32> to vector<24x1xf32>
    %60 = vector.broadcast %59 : vector<24x1xf32> to vector<24x256xf32>
    %61 = arith.mulf %60, %58 : vector<24x256xf32>
    %62 = arith.addf %55, %61 : vector<24x256xf32>
    %c241_i32 = arith.constant 241 : i32
    %63 = tpu.dynamic_rotate %10 by %c241_i32 dim 1 : vector<24x256xf32>, i32 -> vector<24x256xf32>
    %64 = arith.andi %17, %19 : vector<24x256xi1>
    %cst_18 = arith.constant 0.000000e+00 : f32
    %65 = vector.broadcast %cst_18 : f32 to vector<24x256xf32>
    %66 = arith.select %64, %63, %65 : vector<24x256xi1>, vector<24x256xf32>
    %67 = vector.extract_strided_slice %22 {offsets = [0, 6], sizes = [24, 1], strides = [1, 1]} : vector<24x9xf32> to vector<24x1xf32>
    %68 = vector.broadcast %67 : vector<24x1xf32> to vector<24x256xf32>
    %69 = arith.mulf %68, %66 : vector<24x256xf32>
    %70 = arith.addf %62, %69 : vector<24x256xf32>
    %c240_i32_19 = arith.constant 240 : i32
    %71 = tpu.dynamic_rotate %10 by %c240_i32_19 dim 1 : vector<24x256xf32>, i32 -> vector<24x256xf32>
    %cst_20 = arith.constant 0.000000e+00 : f32
    %72 = vector.broadcast %cst_20 : f32 to vector<24x256xf32>
    %73 = arith.select %17, %71, %72 : vector<24x256xi1>, vector<24x256xf32>
    %74 = vector.extract_strided_slice %22 {offsets = [0, 7], sizes = [24, 1], strides = [1, 1]} : vector<24x9xf32> to vector<24x1xf32>
    %75 = vector.broadcast %74 : vector<24x1xf32> to vector<24x256xf32>
    %76 = arith.mulf %75, %73 : vector<24x256xf32>
    %77 = arith.addf %70, %76 : vector<24x256xf32>
    %c239_i32 = arith.constant 239 : i32
    %78 = tpu.dynamic_rotate %10 by %c239_i32 dim 1 : vector<24x256xf32>, i32 -> vector<24x256xf32>
    %79 = arith.andi %17, %21 : vector<24x256xi1>
    %cst_21 = arith.constant 0.000000e+00 : f32
    %80 = vector.broadcast %cst_21 : f32 to vector<24x256xf32>
    %81 = arith.select %79, %78, %80 : vector<24x256xi1>, vector<24x256xf32>
    %82 = vector.extract_strided_slice %22 {offsets = [0, 8], sizes = [24, 1], strides = [1, 1]} : vector<24x9xf32> to vector<24x1xf32>
    %83 = vector.broadcast %82 : vector<24x1xf32> to vector<24x256xf32>
    %84 = arith.mulf %83, %81 : vector<24x256xf32>
    %85 = arith.addf %77, %84 : vector<24x256xf32>
    %c0_22 = arith.constant 0 : index
    %c1 = arith.constant 1 : index
    %86 = vector.load %arg5[%c0_22, %c1] : memref<24x2xf32, #tpu.memory_space<vmem>>, vector<24x1xf32>
    %87 = vector.broadcast %86 : vector<24x1xf32> to vector<24x256xf32>
    %88 = arith.addf %85, %87 : vector<24x256xf32>
    %cst_23 = arith.constant 0.000000e+00 : f32
    %cst_24 = arith.constant 6.000000e+00 : f32
    %89 = vector.broadcast %cst_23 : f32 to vector<24x256xf32>
    %90 = arith.maximumf %89, %88 : vector<24x256xf32>
    %91 = vector.broadcast %cst_24 : f32 to vector<24x256xf32>
    %92 = arith.minimumf %91, %90 : vector<24x256xf32>
    %c0_25 = arith.constant 0 : index
    %c0_26 = arith.constant 0 : index
    %93 = vector.load %arg4[%c0_25, %c0_26] : memref<4x24xf32, #tpu.memory_space<vmem>>, vector<4x24xf32>
    %cst_27 = arith.constant dense<0.000000e+00> : vector<4x256xf32>
    %94 = tpu.matmul %93, %92, %cst_27 {dimension_numbers = #tpu.dot_dimension_numbers<[1], [0], [0], [1], [0, 0, 1, 1], [], []>} : vector<4x24xf32>, vector<24x256xf32>, vector<4x256xf32> -> vector<4x256xf32>
    %c0_28 = arith.constant 0 : index
    %c0_29 = arith.constant 0 : index
    %95 = vector.load %arg6[%c0_28, %c0_29] : memref<4x1xf32, #tpu.memory_space<vmem>>, vector<4x1xf32>
    %96 = vector.broadcast %95 : vector<4x1xf32> to vector<4x256xf32>
    %97 = arith.addf %94, %96 : vector<4x256xf32>
    %98 = arith.addf %97, %1 : vector<4x256xf32>
    %c0_30 = arith.constant 0 : index
    %c0_31 = arith.constant 0 : index
    %c0_32 = arith.constant 0 : index
    %99 = vector.load %arg7[%c0_30, %c0_31, %c0_32] : memref<1x4x256xf32, #tpu.memory_space<vmem>>, vector<1x4x256xf32>
    %100 = vector.shape_cast %99 : vector<1x4x256xf32> to vector<4x256xf32>
    %101 = vector.shape_cast %98 : vector<4x256xf32> to vector<1x4x256xf32>
    tpu.vector_store %arg7[%c0_30, %c0_31, %c0_32], %101 {strides = array<i32>} : memref<1x4x256xf32, #tpu.memory_space<vmem>>, vector<1x4x256xf32>,
    return
  }
  func.func @transform_0(%arg0: i32) -> (i32, i32, i32) {
    %c0_i32 = arith.constant 0 : i32
    %c0_i32_0 = arith.constant 0 : i32
    %c0_i32_1 = arith.constant 0 : i32
    return %arg0, %c0_i32, %c0_i32_0 : i32, i32, i32
  }
  func.func @transform_1(%arg0: i32) -> (i32, i32) {
    %c0_i32 = arith.constant 0 : i32
    %c0_i32_0 = arith.constant 0 : i32
    %c0_i32_1 = arith.constant 0 : i32
    return %c0_i32, %c0_i32_0 : i32, i32
  }
  func.func @transform_2(%arg0: i32) -> (i32, i32) {
    %c0_i32 = arith.constant 0 : i32
    %c0_i32_0 = arith.constant 0 : i32
    %c0_i32_1 = arith.constant 0 : i32
    return %c0_i32, %c0_i32_0 : i32, i32
  }
  func.func @transform_3(%arg0: i32) -> (i32, i32) {
    %c0_i32 = arith.constant 0 : i32
    %c0_i32_0 = arith.constant 0 : i32
    %c0_i32_1 = arith.constant 0 : i32
    return %c0_i32, %c0_i32_0 : i32, i32
  }
  func.func @transform_4(%arg0: i32) -> (i32, i32) {
    %c0_i32 = arith.constant 0 : i32
    %c0_i32_0 = arith.constant 0 : i32
    %c0_i32_1 = arith.constant 0 : i32
    return %c0_i32, %c0_i32_0 : i32, i32
  }
  func.func @transform_5(%arg0: i32) -> (i32, i32) {
    %c0_i32 = arith.constant 0 : i32
    %c0_i32_0 = arith.constant 0 : i32
    %c0_i32_1 = arith.constant 0 : i32
    return %c0_i32, %c0_i32_0 : i32, i32
  }
  func.func @transform_6(%arg0: i32) -> (i32, i32, i32) {
    %c0_i32 = arith.constant 0 : i32
    %c0_i32_0 = arith.constant 0 : i32
    %c0_i32_1 = arith.constant 0 : i32
    return %arg0, %c0_i32, %c0_i32_0 : i32, i32, i32
  }
}

</mosaic_0001>

<bundles_post_ra>
// kernel: tpu_custom_call.1
= control target key start
LH: loop header
LB: loop body
LE: loop exit
PB: predicated region body
PF: predicated region fallthrough
CT: control target
= control target key end

     0   :  { %11 = vsyncpa [#allocation3], 0  ;;  %s1943_s0 = inlined_call_operand.vmem [shape: f32[2,4,256], index: 0, kind: input, shape index: {}]   ;;  %s1944_s1 = inlined_call_operand.vmem [shape: f32[24,4], index: 1, kind: input, shape index: {}]   ;;  %s1945_s2 = inlined_call_operand.vmem [shape: f32[24,9], index: 2, kind: input, shape index: {}]   ;;  %s1946_s3 = inlined_call_operand.vmem [shape: f32[4,24], index: 3, kind: input, shape index: {}]   ;;  %s1947_s4 = inlined_call_operand.vmem [shape: f32[24,2], index: 4, kind: input, shape index: {}]   ;;  %s1948_s5 = inlined_call_operand.vmem [shape: f32[4,1], index: 5, kind: input, shape index: {}]   ;;  %s1949_s6 = inlined_call_operand.hbm [shape: f32[2,4,256], index: 6, kind: output, shape index: {}]  }
   0x1   :  { %13 = vsyncpa [#allocation3 + $0x1], 0  ;;  %s1243_s21 = smov 0   ;;  %s1245_s22 = smov 0  }
   0x2   :  { %s1247_s23 = smov 0   ;;  %s1249_s24 = smov 0  }
   0x3 LB: > { %s1264_s25 = sadd.s32 4294967295, %s1187_s24   ;;  %s1021_s26 = sadd.s32 4294967294, %s1187_s24   ;;  %s1187_s24 = sphi %s1249_s24, %s2009_s24   ;;  %s1183_s23 = sphi %s1247_s23, %s2008_s23   ;;  %s1179_s22 = sphi %s1245_s22, %s2007_s22   ;;  %s1175_s21 = sphi %s1243_s21, %s2006_s21  }
   0x4   : > { %s1268_s27 = sadd.s32 1, %s1187_s24   ;;  %s157_s28 = sadd.s32 1, %s1183_s23 }
   0x5   : > { %s154_s29 = ssub.s32 %s1187_s24, %s1268_s27  ;;  %p167_p0 = scmp.ne.s32.totalorder %s1183_s23, %s1179_s22 }
   0x6   : > { %p155_p1 = scmp.eq.s32.totalorder %s154_s29, 0  ;;  %p168_p2 = scmp.eq.s32.totalorder %s1264_s25, 1 }
   0x7   : > { %p173_p3 = scmp.ne.s32.totalorder %s1179_s22, %s1175_s21  ;;  %p174_p4 = scmp.eq.s32.totalorder %s1021_s26, 1 }
   0x8   : > { %s1279_s30 = scalar_select %p155_p1, %s1183_s23, %s157_s28  }
   0x9   : > { %p1281_p5 = por %p168_p2, %p167_p0  ;;  %p1285_p6 = por %p174_p4, %p173_p3 }
   0xa   : > { %p1024_p7 = scmp.ge.s32.totalorder %s1187_s24, 1  ;;  %p215_p8 = scmp.lt.s32.totalorder %s1187_s24, 3 }
   0xc   : > { %p216_p9 = pnand %p1024_p7, %p215_p8 }
   0xe   : > { %219 = sbr.rel (%p216_p9) target bundleno = 724 (0x2d4), region = 44 }
  0x15   : > { %p245_p10 = scmp.lt.s32.totalorder %s1264_s25, 1  ;;  %v1189_v0 = vmov 0.0   ;;  %v1295_v1 = vld [vmem:[%s1947_s4] sm:$0xff]  ;;  %v1190_v2 = vmov 0   ;;  %v1303_v3 = vld [vmem:[%s1947_s4 + $0x10] sm:$0xff]  ;;  %v1310_v4 = vld [vmem:[%s1947_s4 + $0x8] sm:$0xff] }
  0x16   : > { %353 = vmatprep.mubr.f32.mxu0 %v1189_v0  ;;  %932 = vmatprep.mubr.f32.mxu1 %v1189_v0  ;;  %v1318_v5 = vld [vmem:[%s1945_s2] sm:$0xff]  ;;  %vm284_vm0 = vcmask 1043456   ;;  %v1191_v8 = vmov 4   ;;  %vm274_vm1 = vcmask 31744   ;;  %v398_v10 = vld [vmem:[%s1945_s2 + $0x8] sm:$0xff]  ;;  %v399_v12 = vld [vmem:[%s1945_s2 + $0x10] sm:$0xff] }
  0x17   : > { %s246_s11 = scalar_select %p245_p10, %s1264_s25, 1  ;;  %1102 = vset.pattern.permute.xlu0 %v1190_v2  ;;  %1103 = vset.pattern.permute.xlu1 %v1190_v2  ;;  %v251_v9 = vld [vmem:[%s1944_s1] sm:$0xff]  ;;  %v252_v11 = vld [vmem:[%s1944_s1 + $0x8] sm:$0xff]  ;;  %v253_v13 = vld [vmem:[%s1944_s1 + $0x10] sm:$0xff]  ;;  %v1192_v14 = vmov 2   ;;  %v1193_v15 = vmov 1  }
  0x18   : > { %259 = vperm.xlu0 %1102, %v1295_v1   ;;  %269 = vperm.xlu1 %1103, %v1303_v3   ;;  %v1194_v16 = vmov 3   ;;  %v1195_v17 = vmov 5   ;;  %v1196_v18 = vmov 6   ;;  %v1197_v19 = vmov 7   ;;  %s1199_s17 = smov 15   ;;  %s1200_s18 = smov 17  }
  0x19   : > { %s1039_s14 = sshll.u32 %s246_s11, 3  ;;  %v1198_v20 = vmov 8   ;;  %s1202_s20 = smov 16  }
  0x1a   : > { %s249_s19 = scalar_lea.vmem %s1943_s0, %s1039_s14  ;;  %s1203_s26 = smov 127  }
  0x1b   : > { %v1320_v6 = vld [vmem:[%s249_s19] sm:$0xff]  ;;  %s1201_s19 = smov 1   ;;  %s1204_s28 = smov 113  }
  0x1c   : > { %1965 = vst [vmem:[#allocation5_spill] sm:$0xff] %v1320_v6  ;;  %v1324_v7 = vcombine.high %v1320_v6, %v1320_v6  ;;  %264 = vperm.xlu0 %1102, %v1310_v4   ;;  %1104 = vset.pattern.permute.xlu1 %v1191_v8  ;;  %s1205_s29 = smov 112   ;;  %s1206_s9 = smov 111  }
  0x1d   : > { %402 = vperm.xlu1 %1104, %v1318_v5   ;;  %s242_s14 = sand.u32 1, %s1179_s22   ;;  %s1040_s16 = sshll.u32 %s1264_s25, 7 }
  0x1e   : > { %1966 = vst [vmem:[#allocation6_spill] sm:$0xff] %v1324_v7  ;;  %1028 = vmatprep.subr.msk.mxu0 %vm284_vm0, %v1324_v7  ;;  %s1025_s15 = sshll.u32 %s242_s14, 3  ;;  %s1207_s25 = smov [#allocation2]  }
  0x1f   : > { %1029 = vmatpush1.msk.msra.mxu0 %vm284_vm0, %v1320_v6 }
  0x20   : > { %1030 = vmatmul.mubr.msk.f32.vlgmr.msra.gmra.mrb[0].mxu0 %vm274_vm1, %v251_v9  ;;  %1105 = vset.pattern.permute.xlu0 %v1191_v8 }
  0x21   : > { %359 = vmatprep.mubr.f32.mxu0 %v1189_v0  ;;  %407 = vperm.xlu0 %1105, %v398_v10  }
  0x22   : > { %1106 = vset.pattern.permute.xlu1 %v1190_v2 }
  0x23   : > { %449 = vperm.xlu1 %1106, %v1318_v5  }
  0x24   : > { %1031 = vmatmul.mubr.msk.f32.gmra.mrb[2].mxu0 %vm274_vm1, %v252_v11 }
  0x25   : > { %365 = vmatprep.mubr.f32.mxu0 %v1189_v0  ;;  %412 = vperm.xlu0 %1105, %v399_v12  }
  0x27   : > { %453 = vperm.xlu1 %1106, %v398_v10  }
  0x28   : > { %1032 = vmatmul.mubr.msk.f32.gmra.mrb[4].mxu0 %vm274_vm1, %v253_v13 }
  0x29   : > { %1109 = vset.pattern.permute.xlu0 %v1192_v14 }
  0x2a   : > { %553 = vperm.xlu0 %1109, %v398_v10  }
  0x2b   : > { %1107 = vset.pattern.permute.xlu1 %v1193_v15 }
  0x2c   : > { %502 = vperm.xlu1 %1107, %v398_v10  }
  0x2e   : > { %557 = vperm.xlu0 %1109, %v399_v12  }
  0x30   : > { %1108 = vset.pattern.permute.xlu1 %v1192_v14 }
  0x31   : > { %549 = vperm.xlu1 %1108, %v1318_v5  }
  0x32   : > { %1113 = vset.pattern.permute.xlu0 %v1194_v16 }
  0x33   : > { %602 = vperm.xlu0 %1113, %v398_v10  }
  0x35   : > { %1110 = vset.pattern.permute.xlu1 %v1190_v2 }
  0x36   : > { %457 = vperm.xlu1 %1110, %v399_v12  }
  0x37   : > { %606 = vperm.xlu0 %1113, %v399_v12  }
  0x3a   : > { %1111 = vset.pattern.permute.xlu1 %v1194_v16 }
  0x3b   : > { %598 = vperm.xlu1 %1111, %v1318_v5   ;;  %1116 = vset.pattern.permute.xlu0 %v1195_v17 }
  0x3c   : > { %655 = vperm.xlu0 %1116, %v399_v12  }
  0x3f   : > { %1112 = vset.pattern.permute.xlu1 %v1195_v17 }
  0x40   : > { %647 = vperm.xlu1 %1112, %v1318_v5   ;;  %1118 = vset.pattern.permute.xlu0 %v1196_v18 }
  0x41   : > { %706 = vperm.xlu0 %1118, %v399_v12  }
  0x44   : > { %651 = vperm.xlu1 %1112, %v398_v10  }
  0x45   : > { %1119 = vset.pattern.permute.xlu0 %v1197_v19 }
  0x46   : > { %755 = vperm.xlu0 %1119, %v399_v12  }
  0x48   : > { %1114 = vset.pattern.permute.xlu1 %v1196_v18 }
  0x49   : > { %698 = vperm.xlu1 %1114, %v1318_v5  }
  0x4a   : > { %1121 = vset.pattern.permute.xlu0 %v1198_v20 }
  0x4b   : > { %806 = vperm.xlu0 %1121, %v399_v12  }
  0x4d   : > { %702 = vperm.xlu1 %1114, %v398_v10  }
  0x4f   : > { %1122 = vset.pattern.permute.xlu0 %v1193_v15 }
  0x50   : > { %498 = vperm.xlu0 %1122, %v1318_v5  }
  0x51   : > { %1115 = vset.pattern.permute.xlu1 %v1197_v19 }
  0x52   : > { %747 = vperm.xlu1 %1115, %v1318_v5  }
  0x54   : > { %506 = vperm.xlu0 %1122, %v399_v12  }
  0x56   : > { %751 = vperm.xlu1 %1115, %v398_v10  }
  0x5a   : > { %1117 = vset.pattern.permute.xlu1 %v1198_v20 }
  0x5b   : > { %798 = vperm.xlu1 %1117, %v1318_v5  }
  0x5f   : > { %802 = vperm.xlu1 %1117, %v398_v10  }
  0x63   : > { %1120 = vset.pattern.permute.xlu1 %v1193_v15  ;;  %v858_v15 = vld [vmem:[%s1948_s5] sm:$0xf] }
  0x64   : > { %826 = vperm.xlu1 %1120, %v1295_v1  }
  0x68   : > { %831 = vperm.xlu1 %1120, %v1310_v4  }
  0x97   : > { %v260_v21 = vpop.permute.xlu0 %259  ;;  %v270_v35 = vpop.permute.xlu1 %269 }
  0x9b   : > { %v265_v26 = vpop.permute.xlu0 %264 }
  0x9c   : > { %v1386_v38 = vpop.permute.xlu1 %402 }
  0xa0   : > { %v1430_v48 = vpop.permute.xlu0 %407 }
  0xa2   : > { %v1394_v40 = vpop.permute.xlu1 %449 }
  0xa4   : > { %v1436_v51 = vpop.permute.xlu0 %412 }
  0xa6   : > { %v1404_v41 = vpop.permute.xlu1 %453 }
  0xa9   : > { %v1446_v54 = vpop.permute.xlu0 %553 }
  0xab   : > { %v1410_v43 = vpop.permute.xlu1 %502 }
  0xad   : > { %v1458_v56 = vpop.permute.xlu0 %557 }
  0xae   : > { %1967 = vst [vmem:[#allocation7_spill] sm:$0xff] %v1458_v56 }
  0xb0   : > { %v1418_v46 = vpop.permute.xlu1 %549 }
  0xb2   : > { %v1466_v58 = vpop.permute.xlu0 %602 }
  0xb5   : > { %v1428_v47 = vpop.permute.xlu1 %457 }
  0xb6   : > { %v1478_v60 = vpop.permute.xlu0 %606 }
  0xb7   : > { %1968 = vst [vmem:[#allocation8_spill] sm:$0xff] %v1478_v60 }
  0xba   : > { %v1438_v52 = vpop.permute.xlu1 %598 }
  0xbb   : > { %v1486_v0 = vpop.permute.xlu0 %655 }
  0xbc   : > { %1969 = vst [vmem:[#allocation9_spill] sm:$0xff] %v1486_v0 }
  0xbf   : > { %v1452_v55 = vpop.permute.xlu1 %647 }
  0xc0   : > { %v1497_v5 = vpop.permute.xlu0 %706 }
  0xc1   : > { %1971 = vst [vmem:[#allocation11_spill] sm:$0xff] %v1497_v5 }
  0xc3   : > { %v1460_v57 = vpop.permute.xlu1 %651 }
  0xc5   : > { %v1503_v8 = vpop.permute.xlu0 %755 }
  0xc6   : > { %1972 = vst [vmem:[#allocation12_spill] sm:$0xff] %v1503_v8 }
  0xc8   : > { %v1472_v59 = vpop.permute.xlu1 %698 }
  0xcc   : > { %v1481_v62 = vpop.permute.xlu1 %702 }
  0xd1   : > { %v1490_v1 = vpop.permute.xlu1 %747 }
  0xf3   : > { %v355_v22 = vpop.f32.mrb[0].mxu0 }
  0xf4   : > { %v356_v23 = vadd.f32 %v355_v22, %v260_v21  ;;  %v357_v24 = vpop.f32.mrb[1].mxu0 }
  0xf5   : > { %v358_v36 = vadd.f32 %v357_v24, %v260_v21 }
  0xf6   : > { %v372_v25 = vmax.f32 %v356_v23, 0.0 }
  0xf7   : > { %v361_v27 = vpop.f32.mrb[2].mxu0  ;;  %v373_v37 = vmax.f32 %v358_v36, 0.0 }
  0xf8   : > { %v1360_v28 = vmin.f32 %v372_v25, 6.0  ;;  %v362_v29 = vadd.f32 %v361_v27, %v265_v26  ;;  %v363_v30 = vpop.f32.mrb[3].mxu0 }
  0xf9   : > { %v1392_v39 = vmin.f32 %v373_v37, 6.0  ;;  %v364_v42 = vadd.f32 %v363_v30, %v265_v26  ;;  %v384_v26 = vlaneseq }
  0xfa   : > { %521 = vrot.lane.b32.xlu0 %v1360_v28, %s1199_s17  ;;  %421 = vrot.lane.b32.xlu1 %v1360_v28, %s1200_s18  ;;  %v374_v32 = vmax.f32 %v362_v29, 0.0  ;;  %v415_v56 = vmul.f32 %v1386_v38, %v1360_v28 }
  0xfb   : > { %v367_v31 = vpop.f32.mrb[4].mxu0  ;;  %v375_v44 = vmax.f32 %v364_v42, 0.0  ;;  %v1548_v30 = vand.u32 127, %v384_v26 }
  0xfc   : > { %v1366_v33 = vpop.f32.mrb[5].mxu0  ;;  %v1372_v34 = vmin.f32 %v374_v32, 6.0  ;;  %v368_v49 = vadd.f32 %v367_v31, %v270_v35 }
  0xfd   : > { %v1416_v45 = vmin.f32 %v375_v44, 6.0  ;;  %v370_v61 = vadd.f32 %v1366_v33, %v270_v35  ;;  %v1551_v31 = vadd.s32 128, %v1548_v30  ;;  %v387_v32 = vand.u32 15, %v1548_v30 }
  0xfe   : > { %572 = vrot.lane.b32.xlu0 %v1360_v28, %s1201_s19  ;;  %472 = vrot.lane.b32.xlu1 %v1360_v28, %s1202_s20  ;;  %v376_v50 = vmax.f32 %v368_v49, 0.0  ;;  %vm1961_vm2 = vcmp.ge.s32.totalorder %v1548_v30, 16  ;;  %vm433_vm4 = vcmp.lt.s32.totalorder %v1548_v30, 17  ;;  %vm1960_vm6 = vcmp.lt.s32.totalorder %v1548_v30, 16 }
  0xff   : > { %v377_v63 = vmax.f32 %v370_v61, 0.0  ;;  %v388_v36 = vand.u32 15, %v1551_v31  ;;  %vm1558_vm3 = vcmp.ge.s32.totalorder %v387_v32, 1  ;;  %vm1588_vm8 = vcmp.le.s32.totalorder %v387_v32, 14 }
 0x100   : > { %v1444_v53 = vmin.f32 %v376_v50, 6.0  ;;  %vm1569_vm5 = vmand %vm1961_vm2, %vm1558_vm3  ;;  %vm533_vm9 = vcmp.lt.s32.totalorder %v1548_v30, 15  ;;  %vm584_vm10 = vcmp.lt.s32.totalorder %v1548_v30, 1  ;;  %vm633_vm13 = vcmp.lt.s32.totalorder %v1548_v30, 127 }
 0x101   : > { %v1493_v4 = vmin.f32 %v377_v63, 6.0  ;;  %vm1576_vm7 = vcmp.ge.s32.totalorder %v388_v36, 1  ;;  %vm1605_vm11 = vmand %vm1961_vm2, %vm1588_vm8  ;;  %vm1612_vm12 = vcmp.le.s32.totalorder %v388_v36, 14  ;;  %vm392_vm14 = vcmp.lt.s32.totalorder %v1551_v31, 240 }
 0x102   : > { %621 = vrot.lane.b32.xlu0 %v1360_v28, %s1203_s26  ;;  %423 = vrot.lane.b32.xlu1 %v1372_v34, %s1200_s18  ;;  %vm682_vm15 = vcmp.lt.s32.totalorder %v1548_v30, 113  ;;  %vm1662_vm0 = vmand %vm392_vm14, %vm1576_vm7  ;;  %vm733_vm1 = vcmp.lt.s32.totalorder %v1548_v30, 112 }
 0x103   : > { %1970 = vst [vmem:[#allocation10_spill] sm:$0xff] %v1493_v4 }
 0x106   : > { %670 = vrot.lane.b32.xlu0 %v1360_v28, %s1204_s28  ;;  %474 = vrot.lane.b32.xlu1 %v1372_v34, %s1202_s20 }
 0x10a   : > { %721 = vrot.lane.b32.xlu0 %v1360_v28, %s1205_s29  ;;  %523 = vrot.lane.b32.xlu1 %v1372_v34, %s1199_s17 }
 0x10e   : > { %770 = vrot.lane.b32.xlu0 %v1360_v28, %s1206_s9  ;;  %574 = vrot.lane.b32.xlu1 %v1372_v34, %s1201_s19 }
 0x112   : > { %427 = vrot.lane.b32.xlu0 %v1392_v39, %s1200_s18  ;;  %623 = vrot.lane.b32.xlu1 %v1372_v34, %s1203_s26 }
 0x116   : > { %478 = vrot.lane.b32.xlu0 %v1392_v39, %s1202_s20  ;;  %672 = vrot.lane.b32.xlu1 %v1372_v34, %s1204_s28 }
 0x11a   : > { %527 = vrot.lane.b32.xlu0 %v1392_v39, %s1199_s17  ;;  %723 = vrot.lane.b32.xlu1 %v1372_v34, %s1205_s29 }
 0x11e   : > { %578 = vrot.lane.b32.xlu0 %v1392_v39, %s1201_s19  ;;  %772 = vrot.lane.b32.xlu1 %v1372_v34, %s1206_s9 }
 0x122   : > { %627 = vrot.lane.b32.xlu0 %v1392_v39, %s1203_s26  ;;  %429 = vrot.lane.b32.xlu1 %v1416_v45, %s1200_s18 }
 0x126   : > { %676 = vrot.lane.b32.xlu0 %v1392_v39, %s1204_s28  ;;  %480 = vrot.lane.b32.xlu1 %v1416_v45, %s1202_s20 }
 0x12a   : > { %727 = vrot.lane.b32.xlu0 %v1392_v39, %s1205_s29  ;;  %529 = vrot.lane.b32.xlu1 %v1416_v45, %s1199_s17 }
 0x12e   : > { %776 = vrot.lane.b32.xlu0 %v1392_v39, %s1206_s9  ;;  %580 = vrot.lane.b32.xlu1 %v1416_v45, %s1201_s19 }
 0x132   : > { %425 = vrot.lane.b32.xlu0 %v1444_v53, %s1200_s18  ;;  %629 = vrot.lane.b32.xlu1 %v1416_v45, %s1203_s26 }
 0x136   : > { %476 = vrot.lane.b32.xlu0 %v1444_v53, %s1202_s20  ;;  %678 = vrot.lane.b32.xlu1 %v1416_v45, %s1204_s28 }
 0x13a   : > { %525 = vrot.lane.b32.xlu0 %v1444_v53, %s1199_s17  ;;  %729 = vrot.lane.b32.xlu1 %v1416_v45, %s1205_s29 }
 0x13e   : > { %625 = vrot.lane.b32.xlu0 %v1444_v53, %s1203_s26  ;;  %778 = vrot.lane.b32.xlu1 %v1416_v45, %s1206_s9 }
 0x142   : > { %725 = vrot.lane.b32.xlu0 %v1444_v53, %s1205_s29  ;;  %576 = vrot.lane.b32.xlu1 %v1444_v53, %s1201_s19 }
 0x146   : > { %836 = vperm.xlu0 %1122, %v1303_v3   ;;  %674 = vrot.lane.b32.xlu1 %v1444_v53, %s1204_s28  ;;  %v1499_v3 = vpop.permute.xlu1 %751 }
 0x14a   : > { %774 = vrot.lane.b32.xlu1 %v1444_v53, %s1206_s9  ;;  %1123 = vset.pattern.permute.xlu0 %v1190_v2  ;;  %v1507_v9 = vpop.permute.xlu1 %798  ;;  %v1511_v2 = vpop.permute.xlu0 %806 }
 0x14b   : > { %1973 = vst [vmem:[#allocation13_spill] sm:$0xff] %v1511_v2  ;;  %861 = vperm.xlu0 %1123, %v858_v15  }
 0x14e   : > { %431 = vrot.lane.b32.xlu1 %v1493_v4, %s1200_s18  ;;  %v1513_v10 = vpop.permute.xlu1 %802  ;;  %v1517_v11 = vpop.permute.xlu0 %498 }
 0x152   : > { %482 = vrot.lane.b32.xlu1 %v1493_v4, %s1202_s20  ;;  %v1519_v12 = vpop.permute.xlu1 %826  ;;  %v1525_v13 = vpop.permute.xlu0 %506 }
 0x153   : > { %1974 = vst [vmem:[#allocation14_spill] sm:$0xff] %v1525_v13  ;;  %v416_v13 = vmul.f32 %v1386_v38, %v1392_v39 }
 0x156   : > { %531 = vrot.lane.b32.xlu1 %v1493_v4, %s1199_s17  ;;  %v1527_v14 = vpop.permute.xlu1 %831  ;;  %s244_s17 = scalar_lea.vmem [#allocation2], %s1025_s15 }
 0x157   : > { %s962_s18 = sshll.u32 %s244_s17, 4  ;;  %s1903_s18 = int_to_ptr.vmem [resolvable:$true] %s962_s18 }
 0x15a   : > { %582 = vrot.lane.b32.xlu1 %v1493_v4, %s1201_s19 }
 0x15e   : > { %631 = vrot.lane.b32.xlu1 %v1493_v4, %s1203_s26  ;;  %s1901_s26 = scalar_lea.hbm %s1949_s6, %s1040_s16 }
 0x162   : > { %680 = vrot.lane.b32.xlu1 %v1493_v4, %s1204_s28  ;;  %s948_s28 = scalar_lea.sflag [#allocation3], %s242_s14 }
 0x166   : > { %731 = vrot.lane.b32.xlu1 %v1493_v4, %s1205_s29  ;;  %s1125_s29 = scalar_lea.vmem %s1903_s18, 128 }
 0x167   : > { %p1126_p11 = scmp.ne.s32.totalorder %s1903_s18, %s1125_s29 }
 0x169   : > { %p1127_p12 = pnand %p1126_p11, %p1281_p5 }
 0x16a   : > { %780 = vrot.lane.b32.xlu1 %v1493_v4, %s1206_s9  ;;  %s1129_s9 = sshll.u32 %s1207_s25, 4  ;;  %s1130_s9 = int_to_ptr.vmem [resolvable:$false] %s1129_s9 }
 0x16b   : > { %p1128_p13 = pneg %p1127_p12  ;;  %s1131_s10 = scalar_lea.vmem %s1130_s9, 256 }
 0x16c   : > { %v522_v16 = vpop.permute.xlu0 %521  ;;  %v422_v17 = vpop.permute.xlu1 %421  ;;  %p1132_p0 = scmp.lt.s32.totalorder %s1903_s18, %s1130_s9  ;;  %p1133_p1 = scmp.lt.s32.totalorder %s1131_s10, %s1125_s29 }
 0x16e   : > { %p1134_p2 = por %p1133_p1, %p1132_p0 }
 0x170   : > { %v573_v18 = vpop.permute.xlu0 %572  ;;  %v473_v19 = vpop.permute.xlu1 %472  ;;  %p1135_p3 = pnand %p1134_p2, %p1128_p13 }
 0x174   : > { %v622_v20 = vpop.permute.xlu0 %621  ;;  %v1534_v21 = vpop.permute.xlu1 %423 }
 0x178   : > { %v1536_v22 = vpop.permute.xlu0 %670  ;;  %v1538_v23 = vpop.permute.xlu1 %474 }
 0x17c   : > { %v1540_v24 = vpop.permute.xlu0 %721  ;;  %v1542_v25 = vpop.permute.xlu1 %523 }
 0x180   : > { %v1544_v27 = vpop.permute.xlu0 %770  ;;  %v1546_v29 = vpop.permute.xlu1 %574 }
 0x184   : > { %v428_v33 = vpop.permute.xlu0 %427  ;;  %v1554_v35 = vpop.permute.xlu1 %623 }
 0x185   : > { %v437_v50 = vsel %vm433_vm4, %v428_v33, %v422_v17  ;;  %v434_v63 = vsel %vm433_vm4, %v422_v17, %v428_v33 }
 0x186   : > { %v442_v7 = vsel %vm1569_vm5, %v437_v50, 0.0  ;;  %v443_v8 = vsel %vm1576_vm7, %v434_v63, 0.0 }
 0x187   : > { %v460_v5 = vmul.f32 %v1394_v40, %v442_v7  ;;  %v461_v0 = vmul.f32 %v1394_v40, %v443_v8 }
 0x188   : > { %v479_v42 = vpop.permute.xlu0 %478  ;;  %v1563_v44 = vpop.permute.xlu1 %672 }
 0x189   : > { %v488_v6 = vsel %vm1960_vm6, %v479_v42, %v473_v19  ;;  %v485_v4 = vsel %vm1960_vm6, %v473_v19, %v479_v42  ;;  %v466_v28 = vadd.f32 %v460_v5, %v415_v56  ;;  %v467_v19 = vadd.f32 %v461_v0, %v416_v13 }
 0x18a   : > { %v491_v50 = vsel %vm1961_vm2, %v488_v6, 0.0  ;;  %v510_v42 = vmul.f32 %v1517_v11, %v485_v4 }
 0x18b   : > { %v509_v40 = vmul.f32 %v1517_v11, %v491_v50 }
 0x18c   : > { %v528_v15 = vpop.permute.xlu0 %527  ;;  %v1582_v26 = vpop.permute.xlu1 %723 }
 0x18d   : > { %v537_v63 = vsel %vm533_vm9, %v528_v15, %v522_v16  ;;  %v534_v6 = vsel %vm533_vm9, %v522_v16, %v528_v15  ;;  %v515_v4 = vadd.f32 %v509_v40, %v466_v28  ;;  %v516_v40 = vadd.f32 %v510_v42, %v467_v19 }
 0x18e   : > { %v542_v8 = vsel %vm1605_vm11, %v537_v63, 0.0  ;;  %v543_v38 = vsel %vm1612_vm12, %v534_v6, 0.0  ;;  %v417_v28 = vmul.f32 %v1430_v48, %v1372_v34 }
 0x18f   : > { %v561_v11 = vmul.f32 %v1418_v46, %v543_v38 }
 0x190   : > { %v579_v17 = vpop.permute.xlu0 %578  ;;  %v1596_v33 = vpop.permute.xlu1 %772 }
 0x191   : > { %v588_v7 = vsel %vm584_vm10, %v579_v17, %v573_v18  ;;  %v585_v16 = vsel %vm584_vm10, %v573_v18, %v579_v17  ;;  %v560_v17 = vmul.f32 %v1418_v46, %v542_v8 }
 0x192   : > { %v591_v39 = vsel %vm1558_vm3, %v588_v7, 0.0  ;;  %v592_v56 = vsel %vm1576_vm7, %v585_v16, 0.0 }
 0x193   : > { %v609_v13 = vmul.f32 %v1438_v52, %v591_v39  ;;  %v610_v16 = vmul.f32 %v1438_v52, %v592_v56  ;;  %v566_v38 = vadd.f32 %v560_v17, %v515_v4 }
 0x194   : > { %v628_v36 = vpop.permute.xlu0 %627  ;;  %v430_v15 = vpop.permute.xlu1 %429 }
 0x195   : > { %v634_v50 = vsel %vm633_vm13, %v622_v20, %v628_v36  ;;  %v637_v18 = vsel %vm633_vm13, %v628_v36, %v622_v20  ;;  %v435_v5 = vsel %vm433_vm4, %v1534_v21, %v430_v15  ;;  %v438_v0 = vsel %vm433_vm4, %v430_v15, %v1534_v21 }
 0x196   : > { %v640_v6 = vsel %vm1588_vm8, %v634_v50, 0.0  ;;  %v641_v7 = vsel %vm1612_vm12, %v637_v18, 0.0  ;;  %v444_v36 = vsel %vm1569_vm5, %v438_v0, 0.0  ;;  %v445_v15 = vsel %vm1576_vm7, %v435_v5, 0.0 }
 0x197   : > { %v567_v50 = vadd.f32 %v561_v11, %v516_v40  ;;  %v658_v18 = vmul.f32 %v1452_v55, %v640_v6  ;;  %v615_v56 = vadd.f32 %v609_v13, %v566_v38  ;;  %v462_v5 = vmul.f32 %v1404_v41, %v444_v36 }
 0x198   : > { %v677_v63 = vpop.permute.xlu0 %676  ;;  %v481_v20 = vpop.permute.xlu1 %480  ;;  %v463_v0 = vmul.f32 %v1404_v41, %v445_v15  ;;  %v418_v13 = vmul.f32 %v1430_v48, %v1416_v45 }
 0x199   : > { %v683_v46 = vsel %vm682_vm15, %v1536_v22, %v677_v63  ;;  %v686_v21 = vsel %vm682_vm15, %v677_v63, %v1536_v22  ;;  %v659_v22 = vmul.f32 %v1452_v55, %v641_v7  ;;  %v489_v34 = vsel %vm1960_vm6, %v481_v20, %v1538_v23 }
 0x19a   : > { %v691_v39 = vsel %vm1558_vm3, %v683_v46, 0.0  ;;  %v692_v52 = vsel %vm1662_vm0, %v686_v21, 0.0  ;;  %v616_v17 = vadd.f32 %v610_v16, %v567_v50  ;;  %v486_v55 = vsel %vm1960_vm6, %v1538_v23, %v481_v20 }
 0x19b   : > { %v709_v4 = vmul.f32 %v1472_v59, %v691_v39  ;;  %v710_v41 = vmul.f32 %v1472_v59, %v692_v52  ;;  %v664_v6 = vadd.f32 %v658_v18, %v615_v56  ;;  %v493_v23 = vsel %vm1961_vm2, %v489_v34, 0.0  ;;  %vm1730_vm2 = vmand %vm392_vm14, %vm1612_vm12  ;;  %v857_v18 = vld [vmem:[%s1946_s3] sm:$0xf] }
 0x19c   : > { %v728_v19 = vpop.permute.xlu0 %727  ;;  %v530_v42 = vpop.permute.xlu1 %529  ;;  %v665_v7 = vadd.f32 %v659_v22, %v616_v17  ;;  %vm1962_vm6 = vcmp.lt.s32.totalorder %v1548_v30, 111  ;;  %v468_v46 = vadd.f32 %v462_v5, %v417_v28  ;;  %v469_v21 = vadd.f32 %v463_v0, %v418_v13 }
 0x19d   : > { %v535_v11 = vsel %vm533_vm9, %v1542_v25, %v530_v42  ;;  %v538_v63 = vsel %vm533_vm9, %v530_v42, %v1542_v25  ;;  %v512_v45 = vmul.f32 %v1410_v43, %v486_v55  ;;  %v715_v40 = vadd.f32 %v709_v4, %v664_v6 }
 0x19e   : > { %v545_v48 = vsel %vm1612_vm12, %v535_v11, 0.0  ;;  %v737_v25 = vsel %vm733_vm1, %v728_v19, %v1540_v24  ;;  %v544_v16 = vsel %vm1605_vm11, %v538_v63, 0.0  ;;  %v716_v15 = vadd.f32 %v710_v41, %v665_v7 }
 0x19f   : > { %v511_v28 = vmul.f32 %v1410_v43, %v493_v23  ;;  %v734_v38 = vsel %vm733_vm1, %v1540_v24, %v728_v19  ;;  %v563_v50 = vmul.f32 %v1446_v54, %v545_v48  ;;  %v741_v52 = vsel %vm392_vm14, %v737_v25, 0.0 }
 0x1a0   : > { %v581_v20 = vpop.permute.xlu1 %580  ;;  %v777_v59 = vpop.permute.xlu0 %776  ;;  %v562_v19 = vmul.f32 %v1446_v54, %v544_v16  ;;  %v518_v5 = vadd.f32 %v512_v45, %v469_v21  ;;  %v758_v0 = vmul.f32 %v1490_v1, %v734_v38  ;;  %v759_v11 = vmul.f32 %v1490_v1, %v741_v52 }
 0x1a1   : > { %v586_v36 = vsel %vm584_vm10, %v1546_v29, %v581_v20  ;;  %v589_v39 = vsel %vm584_vm10, %v581_v20, %v1546_v29  ;;  %v783_v43 = vsel %vm1962_vm6, %v1544_v27, %v777_v59  ;;  %v786_v24 = vsel %vm1962_vm6, %v777_v59, %v1544_v27 }
 0x1a2   : > { %v593_v29 = vsel %vm1558_vm3, %v589_v39, 0.0  ;;  %v594_v42 = vsel %vm1576_vm7, %v586_v36, 0.0  ;;  %v517_v17 = vadd.f32 %v511_v28, %v468_v46  ;;  %v791_v54 = vsel %vm1588_vm8, %v783_v43, 0.0 }
 0x1a3   : > { %v792_v4 = vsel %vm1730_vm2, %v786_v24, 0.0  ;;  %v611_v55 = vmul.f32 %v1466_v58, %v593_v29  ;;  %v569_v13 = vadd.f32 %v563_v50, %v518_v5  ;;  %v612_v41 = vmul.f32 %v1466_v58, %v594_v42 }
 0x1a4   : > { %v630_v22 = vpop.permute.xlu1 %629  ;;  %v568_v6 = vadd.f32 %v562_v19, %v517_v17  ;;  %v809_v1 = vmul.f32 %v1507_v9, %v791_v54  ;;  %v810_v46 = vmul.f32 %v1507_v9, %v792_v4  ;;  %v764_v25 = vadd.f32 %v758_v0, %v715_v40 }
 0x1a5   : > { %v635_v56 = vsel %vm633_vm13, %v1554_v35, %v630_v22  ;;  %v638_v27 = vsel %vm633_vm13, %v630_v22, %v1554_v35  ;;  %v765_v16 = vadd.f32 %v759_v11, %v716_v15  ;;  %v618_v36 = vadd.f32 %v612_v41, %v569_v13 }
 0x1a6   : > { %v642_v34 = vsel %vm1588_vm8, %v635_v56, 0.0  ;;  %v643_v35 = vsel %vm1612_vm12, %v638_v27, 0.0  ;;  %v617_v45 = vadd.f32 %v611_v55, %v568_v6  ;;  %v815_v50 = vadd.f32 %v809_v1, %v764_v25 }
 0x1a7   : > { %v660_v7 = vmul.f32 %v1460_v57, %v642_v34  ;;  %v661_v48 = vmul.f32 %v1460_v57, %v643_v35  ;;  %v816_v43 = vadd.f32 %v810_v46, %v765_v16  ;;  %v426_v46 = vpop.permute.xlu0 %425 }
 0x1a8   : > { %v679_v63 = vpop.permute.xlu1 %678 }
 0x1a9   : > { %v684_v23 = vsel %vm682_vm15, %v1563_v44, %v679_v63  ;;  %v687_v20 = vsel %vm682_vm15, %v679_v63, %v1563_v44  ;;  %v666_v44 = vadd.f32 %v660_v7, %v617_v45  ;;  %v667_v40 = vadd.f32 %v661_v48, %v618_v36 }
 0x1aa   : > { %v693_v58 = vsel %vm1558_vm3, %v684_v23, 0.0  ;;  %v694_v21 = vsel %vm1662_vm0, %v687_v20, 0.0  ;;  %v840_v56 = vadd.f32 %v1519_v12, %v816_v43 }
 0x1ab   : > { %v711_v59 = vmul.f32 %v1481_v62, %v693_v58  ;;  %v712_v38 = vmul.f32 %v1481_v62, %v694_v21  ;;  %v477_v21 = vpop.permute.xlu0 %476 }
 0x1ac   : > { %v730_v28 = vpop.permute.xlu1 %729  ;;  %v846_v55 = vmax.f32 %v840_v56, 0.0 }
 0x1ad   : > { %v735_v9 = vsel %vm733_vm1, %v1582_v26, %v730_v28  ;;  %v738_v39 = vsel %vm733_vm1, %v730_v28, %v1582_v26  ;;  %v717_v15 = vadd.f32 %v711_v59, %v666_v44  ;;  %v718_v22 = vadd.f32 %v712_v38, %v667_v40 }
 0x1ae   : > { %v743_v57 = vsel %vm392_vm14, %v738_v39, 0.0  ;;  %v760_v24 = vmul.f32 %v1499_v3, %v735_v9  ;;  %v852_v6 = vmin.f32 %v846_v55, 6.0  ;;  %v419_v40 = vmul.f32 %v1436_v51, %v1444_v53 }
 0x1af   : > { %v761_v29 = vmul.f32 %v1499_v3, %v743_v57  ;;  %v839_v3 = vadd.f32 %v1519_v12, %v815_v50  ;;  %v526_v28 = vpop.permute.xlu0 %525 }
 0x1b0   : > { %v779_v62 = vpop.permute.xlu1 %778  ;;  %v766_v5 = vadd.f32 %v760_v24, %v717_v15  ;;  %v1994_v15 = vld [vmem:[#allocation10_spill] sm:$0xff] }
 0x1b1   : > { %v784_v52 = vsel %vm1962_vm6, %v1596_v33, %v779_v62  ;;  %v787_v26 = vsel %vm1962_vm6, %v779_v62, %v1596_v33  ;;  %v767_v0 = vadd.f32 %v761_v29, %v718_v22  ;;  %v845_v13 = vmax.f32 %v839_v3, 0.0  ;;  %v1995_v62 = vld [vmem:[#allocation14_spill] sm:$0xff]  ;;  %v1996_v3 = vld [vmem:[#allocation7_spill] sm:$0xff] }
 0x1b2   : > { %v793_v19 = vsel %vm1588_vm8, %v784_v52, 0.0  ;;  %v794_v42 = vsel %vm1730_vm2, %v787_v26, 0.0  ;;  %vm1991_vm6 = vcmp.lt.s32.totalorder %v1548_v30, 16  ;;  %v420_v24 = vmul.f32 %v1436_v51, %v1994_v15  ;;  %v2003_v15 = vld [vmem:[#allocation13_spill] sm:$0xff] }
 0x1b3   : > { %v811_v27 = vmul.f32 %v1513_v10, %v793_v19  ;;  %v812_v34 = vmul.f32 %v1513_v10, %v794_v42  ;;  %v851_v7 = vmin.f32 %v845_v13, 6.0  ;;  %v626_v26 = vpop.permute.xlu0 %625 }
 0x1b4   : > { %v577_v17 = vpop.permute.xlu1 %576 }
 0x1b5   : > { %v817_v54 = vadd.f32 %v811_v27, %v766_v5  ;;  %v818_v4 = vadd.f32 %v812_v34, %v767_v0 }
 0x1b7   : > { %v842_v33 = vadd.f32 %v1527_v14, %v818_v4  ;;  %v841_v11 = vadd.f32 %v1527_v14, %v817_v54  ;;  %v1997_v4 = vld [vmem:[#allocation8_spill] sm:$0xff] }
 0x1b8   : > { %v675_v41 = vpop.permute.xlu1 %674 }
 0x1b9   : > { %v848_v35 = vmax.f32 %v842_v33, 0.0  ;;  %v847_v63 = vmax.f32 %v841_v11, 0.0 }
 0x1bb   : > { %v854_v12 = vmin.f32 %v848_v35, 6.0  ;;  %v853_v23 = vmin.f32 %v847_v63, 6.0  ;;  %v1998_v63 = vld [vmem:[#allocation9_spill] sm:$0xff] }
 0x1bc   : > { %v1807_v20 = vpop.permute.xlu1 %774 }
 0x1bd   : > { %v1041_v1 = vpack.c.bf16 %v854_v12, %v852_v6  ;;  %v1043_v10 = vpack.c.bf16 %v853_v23, %v851_v7 }
 0x1bf   : > { %1042 = vmatprep.subr.bf16.mxu1 %v1041_v1 }
 0x1c0   : > { %v432_v58 = vpop.permute.xlu1 %431  ;;  %1044 = vmatpush1.bf16.msra.mxu1 %v1043_v10 }
 0x1c1   : > { %v436_v14 = vsel %vm433_vm4, %v426_v46, %v432_v58  ;;  %v439_v48 = vsel %vm433_vm4, %v432_v58, %v426_v46  ;;  %vm1992_vm4 = vcmp.ge.s32.totalorder %v1548_v30, 16  ;;  %v1999_v58 = vld [vmem:[#allocation11_spill] sm:$0xff] }
 0x1c2   : > { %v446_v25 = vsel %vm1569_vm5, %v439_v48, 0.0  ;;  %v447_v16 = vsel %vm1576_vm7, %v436_v14, 0.0  ;;  %vm1993_vm5 = vmmov %vm1991_vm6 }
 0x1c3   : > { %v464_v38 = vmul.f32 %v1428_v47, %v446_v25  ;;  %v465_v9 = vmul.f32 %v1428_v47, %v447_v16 }
 0x1c4   : > { %v483_v45 = vpop.permute.xlu1 %482 }
 0x1c5   : > { %v490_v36 = vsel %vm1991_vm6, %v483_v45, %v477_v21  ;;  %v487_v57 = vsel %vm1993_vm5, %v477_v21, %v483_v45  ;;  %v470_v19 = vadd.f32 %v464_v38, %v419_v40  ;;  %v471_v42 = vadd.f32 %v465_v9, %v420_v24  ;;  %v726_v45 = vpop.permute.xlu0 %725 }
 0x1c6   : > { %v495_v39 = vsel %vm1992_vm4, %v490_v36, 0.0  ;;  %v514_v56 = vmul.f32 %v1995_v62, %v487_v57 }
 0x1c7   : > { %v513_v22 = vmul.f32 %v1995_v62, %v495_v39 }
 0x1c8   : > { %v532_v59 = vpop.permute.xlu1 %531  ;;  %v520_v55 = vadd.f32 %v514_v56, %v471_v42 }
 0x1c9   : > { %v539_v44 = vsel %vm533_vm9, %v532_v59, %v526_v28  ;;  %v536_v49 = vsel %vm533_vm9, %v526_v28, %v532_v59  ;;  %v519_v54 = vadd.f32 %v513_v22, %v470_v19  ;;  %v2000_v28 = vld [vmem:[#allocation12_spill] sm:$0xff]  ;;  %v837_v22 = vpop.permute.xlu0 %836 }
 0x1ca   : > { %v546_v47 = vsel %vm1605_vm11, %v539_v44, 0.0  ;;  %v547_v52 = vsel %vm1612_vm12, %v536_v49, 0.0 }
 0x1cb   : > { %v564_v32 = vmul.f32 %v1996_v3, %v546_v47  ;;  %v565_v34 = vmul.f32 %v1996_v3, %v547_v52 }
 0x1cc   : > { %v583_v50 = vpop.permute.xlu1 %582 }
 0x1cd   : > { %v590_v43 = vsel %vm584_vm10, %v583_v50, %v577_v17  ;;  %v587_v29 = vsel %vm584_vm10, %v577_v17, %v583_v50  ;;  %v570_v35 = vadd.f32 %v564_v32, %v519_v54  ;;  %v571_v23 = vadd.f32 %v565_v34, %v520_v55  ;;  %v862_v42 = vpop.permute.xlu0 %861  ;;  %v2004_v32 = vld [vmem:[#allocation5_spill] sm:$0xff] }
 0x1ce   : > { %v595_v53 = vsel %vm1558_vm3, %v590_v43, 0.0  ;;  %v596_v5 = vsel %vm1576_vm7, %v587_v29, 0.0 }
 0x1cf   : > { %v613_v33 = vmul.f32 %v1997_v4, %v595_v53  ;;  %v614_v11 = vmul.f32 %v1997_v4, %v596_v5 }
 0x1d0   : > { %v632_v51 = vpop.permute.xlu1 %631 }
 0x1d1   : > { %v636_v0 = vsel %vm633_vm13, %v626_v26, %v632_v51  ;;  %v639_v27 = vsel %vm633_vm13, %v632_v51, %v626_v26  ;;  %v619_v46 = vadd.f32 %v613_v33, %v570_v35  ;;  %v620_v14 = vadd.f32 %v614_v11, %v571_v23 }
 0x1d2   : > { %v644_v17 = vsel %vm1588_vm8, %v636_v0, 0.0  ;;  %v645_v61 = vsel %vm1612_vm12, %v639_v27, 0.0  ;;  %v2005_v0 = vld [vmem:[#allocation6_spill] sm:$0xff] }
 0x1d3   : > { %v662_v6 = vmul.f32 %v1998_v63, %v644_v17  ;;  %v663_v60 = vmul.f32 %v1998_v63, %v645_v61 }
 0x1d4   : > { %v681_v13 = vpop.permute.xlu1 %680 }
 0x1d5   : > { %v685_v12 = vsel %vm682_vm15, %v675_v41, %v681_v13  ;;  %v688_v7 = vsel %vm682_vm15, %v681_v13, %v675_v41  ;;  %v668_v59 = vadd.f32 %v662_v6, %v619_v46  ;;  %v669_v16 = vadd.f32 %v663_v60, %v620_v14 }
 0x1d6   : > { %v695_v1 = vsel %vm1558_vm3, %v685_v12, 0.0  ;;  %v696_v10 = vsel %vm1662_vm0, %v688_v7, 0.0  ;;  %vm2001_vm3 = vcmp.lt.s32.totalorder %v1548_v30, 111 }
 0x1d7   : > { %v713_v21 = vmul.f32 %v1999_v58, %v695_v1  ;;  %v714_v25 = vmul.f32 %v1999_v58, %v696_v10  ;;  %vm2002_vm6 = vmmov %vm2001_vm3 }
 0x1d8   : > { %v732_v48 = vpop.permute.xlu1 %731 }
 0x1d9   : > { %v736_v41 = vsel %vm733_vm1, %v726_v45, %v732_v48  ;;  %v739_v37 = vsel %vm733_vm1, %v732_v48, %v726_v45  ;;  %v719_v36 = vadd.f32 %v713_v21, %v668_v59  ;;  %v720_v39 = vadd.f32 %v714_v25, %v669_v16 }
 0x1da   : > { %v745_v8 = vsel %vm392_vm14, %v739_v37, 0.0  ;;  %v762_v44 = vmul.f32 %v2000_v28, %v736_v41 }
 0x1db   : > { %v763_v38 = vmul.f32 %v2000_v28, %v745_v8 }
 0x1dc   : > { %v781_v9 = vpop.permute.xlu1 %780  ;;  %v768_v43 = vadd.f32 %v762_v44, %v719_v36 }
 0x1dd   : > { %v785_v49 = vsel %vm2001_vm3, %v1807_v20, %v781_v9  ;;  %v788_v50 = vsel %vm2002_vm6, %v781_v9, %v1807_v20  ;;  %v769_v40 = vadd.f32 %v763_v38, %v720_v39 }
 0x1de   : > { %v795_v31 = vsel %vm1588_vm8, %v785_v49, 0.0  ;;  %v796_v57 = vsel %vm1730_vm2, %v788_v50, 0.0  ;;  %vm864_vm2 = vcmask 195584  }
 0x1df   : > { %v813_v24 = vmul.f32 %v2003_v15, %v795_v31  ;;  %v814_v47 = vmul.f32 %v2003_v15, %v796_v57 }
 0x1e1   : > { %v819_v29 = vadd.f32 %v813_v24, %v768_v43  ;;  %v820_v62 = vadd.f32 %v814_v47, %v769_v40 }
 0x1e3   : > { %v844_v52 = vadd.f32 %v837_v22, %v820_v62  ;;  %v843_v26 = vadd.f32 %v837_v22, %v819_v29 }
 0x1e5   : > { %v850_v30 = vmax.f32 %v844_v52, 0.0  ;;  %v849_v20 = vmax.f32 %v843_v26, 0.0 }
 0x1e7   : > { %v856_v2 = vmin.f32 %v850_v30, 6.0  ;;  %v855_v19 = vmin.f32 %v849_v20, 6.0 }
 0x1e9   : > { %872 = vmatprep.subr.mxu1 %v856_v2 }
 0x1ea   : > { %873 = vmatpush1.msra.mxu1 %v855_v19 }
 0x1eb   : > { %1033 = vmatmul.mubr.msk.f32.vlgmr.msra.gmra.mrb[0].mxu1 %vm864_vm2, %v857_v18 }
 0x2be   : > { %v934_v56 = vpop.f32.mrb[0].mxu1 }
 0x2bf   : > { %v935_v53 = vadd.f32 %v934_v56, %v862_v42  ;;  %v936_v51 = vpop.f32.mrb[1].mxu1 }
 0x2c0   : > { %v937_v3 = vadd.f32 %v936_v51, %v862_v42 }
 0x2c1   : > { %v940_v5 = vadd.f32 %v935_v53, %v2004_v32 }
 0x2c2   : > { %v941_v27 = vadd.f32 %v937_v3, %v2005_v0 }
 0x2c4   : > { %v944_v34 = vcombine.low %v940_v5, %v941_v27 }
 0x2c6   : > { %946 = vst [vmem:[%s244_s17] sm:$0xff] %v944_v34 }
 0x2c7   : > { %1138 = shalt.err (!%p1135_p3)
}
 0x2c8   : > { %s1139_s11 = scalar_lea.hbm %s1901_s26, 128  ;;  %s1143_s14 = scalar_lea.hbm %s1949_s6, 256 }
 0x2c9   : > { %p1140_p4 = scmp.ne.s32.totalorder %s1901_s26, %s1139_s11  ;;  %p1144_p9 = scmp.lt.u32.totalorder %s1901_s26, %s1949_s6 }
 0x2ca   : > { %p1145_p10 = scmp.lt.u32.totalorder %s1143_s14, %s1139_s11  ;;  %p1147_p12 = scmp.lt.u32.totalorder %s1139_s11, %s1901_s26 }
 0x2cb   : > { %p1141_p7 = pnand %p1140_p4, %p1281_p5 }
 0x2cc   : > { %p1146_p11 = por %p1145_p10, %p1144_p9 }
 0x2cd   : > { %p1142_p8 = pneg %p1141_p7 }
 0x2ce   : > { %p1148_p13 = por %p1147_p12, %p1146_p11 }
 0x2d0   : > { %p1149_p0 = pnand %p1148_p13, %p1142_p8 }
 0x2d2   : > { %1152 = shalt.err (!%p1149_p0)
}
 0x2d3   : > { %1045 = dma.vmem_to_hbm [thread:$0]  (%p1281_p5), %s1903_s18, 128, %s1901_s26, %s948_s28  }
 0x2d4 PF: > { %p1051_p1 = scmp.ge.s32.totalorder %s1187_s24, 2  ;;  %s974_s17 = sand.u32 1, %s1175_s21  }
 0x2d5   : > { %s975_s19 = scalar_lea.sflag [#allocation3], %s974_s17 }
 0x2d6   : > { %p1048_p2 = pnand %p1051_p1, %p1285_p6 }
 0x2d8   : > { %1170 = dma.done.wait (!%p1048_p2), %s975_s19, 128  }
 0x2d9   : > { %1172 = vsyncadd (!%p1048_p2), %s975_s19, 4294967168  ;;  %p16_p3 = scmp.ge.s32.totalorder %s1268_s27, 4   ;;  %s2006_s21 = smov %s1179_s22 }
 0x2da   : > { %s2007_s22 = smov %s1183_s23  ;;  %s2008_s23 = smov %s1279_s30 }
 0x2db   : > { %s2009_s24 = smov %s1268_s27  ;;  %18 = sbr.rel (!%p16_p3) target bundleno = 3 (0x3), region = 79 }
 0x2e2   :  { %980 = vsyncpa [#allocation3], 1 }
 0x2e3   :  { %982 = vsyncpa [#allocation3 + $0x1], 1 }

</bundles_post_ra>
